<compile_context>
chip_gen: v7x
topology: tpu7x:2x2x1
jax: 0.10.0
libtpu: 0.0.40
codegen_flags: <defaults>
</compile_context>

<pallas_src>
import jax
import jax.numpy as jnp
from jax.experimental import pallas as pl
from jax.experimental.pallas import tpu as pltpu


def _round_up(x, m):
    return ((x + m - 1) // m) * m


def _make_fc_seq_kernel(act):
    """Fused kernel computing act(act(x @ w0t + b0) @ w1t + b1)."""

    def kernel(x_ref, w0_ref, b0_ref, w1_ref, b1_ref, o_ref):
        x = x_ref[...]                      # native dtype (f32 or bf16)

        # Layer 0: MXU matmul in native dtype, f32 accumulation (weights are
        # pre-transposed in the wrapper -> no in-kernel transpose).
        h = jnp.dot(x, w0_ref[...], preferred_element_type=jnp.float32)
        h = act(h + b0_ref[...])            # f32 bias + activation on the VPU
        h = h.astype(x.dtype)               # back to compute dtype for the MXU
        # NOTE: intentional accuracy/throughput trade for bf16 inputs; an fp32
        # PyTorch forward keeps the intermediate in f32.

        # Layer 1.
        y = jnp.dot(h, w1_ref[...], preferred_element_type=jnp.float32)
        y = act(y + b1_ref[...])

        o_ref[...] = y.astype(o_ref.dtype)

    return kernel


def _pick_block_m(batch, cap=2048):
    """Batch tile: multiple of 8, as large as possible up to `cap`.

    If the whole (8-rounded) batch fits in a single tile, split it in two so
    the 'parallel' grid axis can shard across v7x's two TensorCores (costs
    nothing on single-TC v5e/v6e).
    """
    b8 = _round_up(batch, 8)
    if b8 <= 8:
        return 8
    bm = min(cap, b8)
    if bm >= b8:
        bm = _round_up(pl.cdiv(b8, 2), 8)
    return bm


def fc_seq_add_bias_vec(x, w0, b0, w1, b1, *, act=None, block_m=None):
    """x: [B, F]; w0, w1: [F, F] in PyTorch [out, in] layout; b0, b1: [F]."""
    if act is None:
        act = lambda v: jnp.maximum(v, 0.0)   # nn.ReLU
    B, F = x.shape
    assert w0.shape == (F, F) and w1.shape == (F, F)
    assert b0.shape == (F,) and b1.shape == (F,)

    # Lane-dense feature dim (multiple of 128).
    F_pad = _round_up(F, 128)

    if block_m is None:
        block_m = _pick_block_m(B)
    B_pad = _round_up(max(B, block_m), block_m)
    grid = (B_pad // block_m,)

    # One-time HBM-side prep: transpose weights to [in, out], zero-pad
    # everything to the padded feature dim, pad the batch to the tile grid.
    w0_t = jnp.pad(jnp.transpose(w0), ((0, F_pad - F), (0, F_pad - F)))
    w1_t = jnp.pad(jnp.transpose(w1), ((0, F_pad - F), (0, F_pad - F)))
    b0_2d = jnp.pad(b0.astype(jnp.float32), (0, F_pad - F)).reshape(1, F_pad)
    b1_2d = jnp.pad(b1.astype(jnp.float32), (0, F_pad - F)).reshape(1, F_pad)
    x_p = jnp.pad(x, ((0, B_pad - B), (0, F_pad - F)))

    # VMEM-resident weight path only works while both (single-buffered) weight
    # matrices fit comfortably in VMEM (v7x: 64 MiB physical / 32 MiB scoped).
    weight_bytes = 2 * F_pad * F_pad * w0_t.dtype.itemsize
    assert weight_bytes <= 24 * 1024 * 1024, (
        f"F={F} too large for the VMEM-resident weight path")
    # TODO(synk): add a K/N-tiled reduction-grid path (pl.when-guarded f32
    # accumulator) for feature dims whose weights no longer fit in VMEM.

    vmem_est = (2 * 2 * block_m * F_pad * x_p.dtype.itemsize   # x+out, dbl-buf
                + weight_bytes + 2 * F_pad * 4)
    vmem_limit = None
    if vmem_est > 12 * 1024 * 1024:        # v5e scoped default is 16 MiB
        vmem_limit = min(int(1.5 * vmem_est), 60 * 1024 * 1024)

    isz = lambda a: a.dtype.itemsize
    cost = pl.CostEstimate(
        flops=2 * 2 * B * F * F,             # two (B,F) x (F,F) matmuls
        transcendentals=0,
        bytes_accessed=(2 * B * F * isz(x)   # x read + out write
                        + 2 * F * F * isz(w0) + 2 * F * 4),
    )

    const = pl.Buffered(1)                   # grid-invariant: single-buffered
    out = pl.pallas_call(
        _make_fc_seq_kernel(act),
        out_shape=jax.ShapeDtypeStruct((B_pad, F_pad), x.dtype),
        grid=grid,
        in_specs=[
            pl.BlockSpec((block_m, F_pad), lambda i: (i, 0)),    # x: batch-tiled
            pl.BlockSpec((F_pad, F_pad), lambda i: (0, 0), pipeline_mode=const),
            pl.BlockSpec((1, F_pad), lambda i: (0, 0), pipeline_mode=const),
            pl.BlockSpec((F_pad, F_pad), lambda i: (0, 0), pipeline_mode=const),
            pl.BlockSpec((1, F_pad), lambda i: (0, 0), pipeline_mode=const),
        ],
        out_specs=pl.BlockSpec((block_m, F_pad), lambda i: (i, 0)),
        compiler_params=pltpu.CompilerParams(
            dimension_semantics=("parallel",),
            vmem_limit_bytes=vmem_limit,
        ),
        cost_estimate=cost,
    )(x_p, w0_t, b0_2d, w1_t, b1_2d)

    return out[:B, :F]


def fc_seq_add_bias_vec_ref(x, w0, b0, w1, b1):
    """Pure-JAX f32 reference mirroring the PyTorch forward."""
    f32 = jnp.float32
    h = jnp.maximum(x.astype(f32) @ w0.astype(f32).T + b0.astype(f32), 0.0)
    return jnp.maximum(h @ w1.astype(f32).T + b1.astype(f32), 0.0)


def _make_params(key, batch, features, dtype):
    kx, kw0, kw1, kb0, kb1 = jax.random.split(key, 5)
    x = jax.random.normal(kx, (batch, features), jnp.float32).astype(dtype)
    # nn.Linear default init ~ uniform(-1/sqrt(F), 1/sqrt(F)).
    bound = 1.0 / float(features) ** 0.5
    w0 = jax.random.uniform(kw0, (features, features), jnp.float32, -bound, bound).astype(dtype)
    w1 = jax.random.uniform(kw1, (features, features), jnp.float32, -bound, bound).astype(dtype)
    # nn.init.uniform_ -> U[0, 1).
    b0 = jax.random.uniform(kb0, (features,), jnp.float32, 0.0, 1.0)
    b1 = jax.random.uniform(kb1, (features,), jnp.float32, 0.0, 1.0)
    return x, w0, b0, w1, b1


if __name__ == "__main__":
    key = jax.random.PRNGKey(0)
    k1, k2, k3 = jax.random.split(key, 3)

    # (batch, features, dtype, atol, rtol)
    configs = [
        # Original tiny module shape (input_output = 32): F padded to 128.
        (8, 32, jnp.float32, 1e-5, 1e-5),
        # Lane-dense multi-tile config: grid of 2 parallel batch tiles.
        (512, 128, jnp.float32, 1e-5, 1e-5),
        # bf16 + ragged batch: exercises batch padding and native-dtype MXU.
        (264, 128, jnp.bfloat16, 5e-2, 5e-2),
    ]

    for cfg_key, (batch, features, dtype, atol, rtol) in zip((k1, k2, k3), configs):
        x, w0, b0, w1, b1 = _make_params(cfg_key, batch, features, dtype)
        out = fc_seq_add_bias_vec(x, w0, b0, w1, b1)
        out = jax.block_until_ready(out)
        assert out.shape == (batch, features) and out.dtype == dtype

        ref = fc_seq_add_bias_vec_ref(x, w0, b0, w1, b1)
        assert jnp.allclose(out.astype(jnp.float32), ref, atol=atol, rtol=rtol), (
            f"mismatch vs reference: batch={batch} features={features} dtype={dtype}")

    print("KERNEL_OK")
</pallas_src>

<mosaic_0001>
module attributes {stable_mosaic.version = 11 : i64} {
  func.func @kernel(%arg0: i32, %arg1: memref<8x128xf32, #tpu.memory_space<vmem>>, %arg2: memref<128x128xf32, #tpu.memory_space<vmem>>, %arg3: memref<1x128xf32, #tpu.memory_space<vmem>>, %arg4: memref<128x128xf32, #tpu.memory_space<vmem>>, %arg5: memref<1x128xf32, #tpu.memory_space<vmem>>, %arg6: memref<8x128xf32, #tpu.memory_space<vmem>>) attributes {dimension_semantics = [#tpu.dimension_semantics<parallel>], iteration_bounds = array<i64: 1>, scalar_prefetch = 0 : i64, scratch_operands = 0 : i64, tpu.core_type = #tpu.core_type<tc>, window_params = [{transform_indices = @transform_0, window_bounds = array<i64: 8, 128>}, {pipeline_mode = #tpu.pipeline_mode<synchronous>, transform_indices = @transform_1, window_bounds = array<i64: 128, 128>}, {pipeline_mode = #tpu.pipeline_mode<synchronous>, transform_indices = @transform_2, window_bounds = array<i64: 1, 128>}, {pipeline_mode = #tpu.pipeline_mode<synchronous>, transform_indices = @transform_3, window_bounds = array<i64: 128, 128>}, {pipeline_mode = #tpu.pipeline_mode<synchronous>, transform_indices = @transform_4, window_bounds = array<i64: 1, 128>}, {transform_indices = @transform_5, window_bounds = array<i64: 8, 128>}]} {
    %c0 = arith.constant 0 : index
    %c0_0 = arith.constant 0 : index
    %0 = vector.load %arg1[%c0, %c0_0] : memref<8x128xf32, #tpu.memory_space<vmem>>, vector<8x128xf32>
    %c0_1 = arith.constant 0 : index
    %c0_2 = arith.constant 0 : index
    %1 = vector.load %arg2[%c0_1, %c0_2] : memref<128x128xf32, #tpu.memory_space<vmem>>, vector<128x128xf32>
    %cst = arith.constant dense<0.000000e+00> : vector<8x128xf32>
    %2 = tpu.matmul %0, %1, %cst {dimension_numbers = #tpu.dot_dimension_numbers<[1], [0], [0], [1], [0, 0, 1, 1], [], []>} : vector<8x128xf32>, vector<128x128xf32>, vector<8x128xf32> -> vector<8x128xf32>
    %c0_3 = arith.constant 0 : index
    %c0_4 = arith.constant 0 : index
    %3 = vector.load %arg3[%c0_3, %c0_4] : memref<1x128xf32, #tpu.memory_space<vmem>>, vector<1x128xf32>
    %4 = vector.broadcast %3 : vector<1x128xf32> to vector<8x128xf32>
    %5 = arith.addf %2, %4 : vector<8x128xf32>
    %cst_5 = arith.constant 0.000000e+00 : f32
    %6 = vector.broadcast %cst_5 : f32 to vector<8x128xf32>
    %7 = arith.maximumf %5, %6 : vector<8x128xf32>
    %c0_6 = arith.constant 0 : index
    %c0_7 = arith.constant 0 : index
    %8 = vector.load %arg4[%c0_6, %c0_7] : memref<128x128xf32, #tpu.memory_space<vmem>>, vector<128x128xf32>
    %cst_8 = arith.constant dense<0.000000e+00> : vector<8x128xf32>
    %9 = tpu.matmul %7, %8, %cst_8 {dimension_numbers = #tpu.dot_dimension_numbers<[1], [0], [0], [1], [0, 0, 1, 1], [], []>} : vector<8x128xf32>, vector<128x128xf32>, vector<8x128xf32> -> vector<8x128xf32>
    %c0_9 = arith.constant 0 : index
    %c0_10 = arith.constant 0 : index
    %10 = vector.load %arg5[%c0_9, %c0_10] : memref<1x128xf32, #tpu.memory_space<vmem>>, vector<1x128xf32>
    %11 = vector.broadcast %10 : vector<1x128xf32> to vector<8x128xf32>
    %12 = arith.addf %9, %11 : vector<8x128xf32>
    %cst_11 = arith.constant 0.000000e+00 : f32
    %13 = vector.broadcast %cst_11 : f32 to vector<8x128xf32>
    %14 = arith.maximumf %12, %13 : vector<8x128xf32>
    %c0_12 = arith.constant 0 : index
    %c0_13 = arith.constant 0 : index
    %15 = vector.load %arg6[%c0_12, %c0_13] : memref<8x128xf32, #tpu.memory_space<vmem>>, vector<8x128xf32>
    tpu.vector_store %arg6[%c0_12, %c0_13], %14 {strides = array<i32>} : memref<8x128xf32, #tpu.memory_space<vmem>>, vector<8x128xf32>,
    return
  }
  func.func @transform_0(%arg0: i32) -> (i32, i32) {
    %c0_i32 = arith.constant 0 : i32
    %c0_i32_0 = arith.constant 0 : i32
    return %arg0, %c0_i32 : i32, i32
  }
  func.func @transform_1(%arg0: i32) -> (i32, i32) {
    %c0_i32 = arith.constant 0 : i32
    %c0_i32_0 = arith.constant 0 : i32
    %c0_i32_1 = arith.constant 0 : i32
    return %c0_i32, %c0_i32_0 : i32, i32
  }
  func.func @transform_2(%arg0: i32) -> (i32, i32) {
    %c0_i32 = arith.constant 0 : i32
    %c0_i32_0 = arith.constant 0 : i32
    %c0_i32_1 = arith.constant 0 : i32
    return %c0_i32, %c0_i32_0 : i32, i32
  }
  func.func @transform_3(%arg0: i32) -> (i32, i32) {
    %c0_i32 = arith.constant 0 : i32
    %c0_i32_0 = arith.constant 0 : i32
    %c0_i32_1 = arith.constant 0 : i32
    return %c0_i32, %c0_i32_0 : i32, i32
  }
  func.func @transform_4(%arg0: i32) -> (i32, i32) {
    %c0_i32 = arith.constant 0 : i32
    %c0_i32_0 = arith.constant 0 : i32
    %c0_i32_1 = arith.constant 0 : i32
    return %c0_i32, %c0_i32_0 : i32, i32
  }
  func.func @transform_5(%arg0: i32) -> (i32, i32) {
    %c0_i32 = arith.constant 0 : i32
    %c0_i32_0 = arith.constant 0 : i32
    return %arg0, %c0_i32 : i32, i32
  }
}

</mosaic_0001>

<bundles_post_ra>
// kernel: tpu_custom_call.1
= control target key start
LH: loop header
LB: loop body
LE: loop exit
PB: predicated region body
PF: predicated region fallthrough
CT: control target
= control target key end

     0   :  { %10 = vsyncpa [#allocation3], 0  ;;  %s638_s0 = inlined_call_operand.hbm [shape: f32[8,128], index: 0, kind: input, shape index: {}]   ;;  %s639_s1 = inlined_call_operand.hbm [shape: f32[128,128], index: 1, kind: input, shape index: {}]   ;;  %s640_s2 = inlined_call_operand.vmem [shape: f32[1,128], index: 2, kind: input, shape index: {}]   ;;  %s641_s3 = inlined_call_operand.hbm [shape: f32[128,128], index: 3, kind: input, shape index: {}]   ;;  %s642_s4 = inlined_call_operand.vmem [shape: f32[1,128], index: 4, kind: input, shape index: {}]   ;;  %s643_s5 = inlined_call_operand.hbm [shape: f32[8,128], index: 5, kind: output, shape index: {}]  }
   0x1   :  { %11 = vsyncpa [#allocation6], 0 }
   0x2   :  { %12 = vsyncpa [#allocation4], 0  ;;  %s523_s18 = smov [#allocation5]   ;;  %s429_s22 = scalar_lea.hbm %s639_s1, 2048 }
   0x3   :  { %s28_s19 = sshll.u32 %s523_s18, 4  ;;  %p430_p0 = scmp.ne.s32.totalorder %s639_s1, %s429_s22  ;;  %s29_s19 = int_to_ptr.vmem [resolvable:$true] %s28_s19 }
   0x4   :  { %p433_p1 = scmp.lt.u32.totalorder %s429_s22, %s639_s1 }
   0x6   :  { %p435_p2 = pnand %p433_p1, %p430_p0 }
   0x8   :  { %438 = shalt.err (!%p435_p2)
}
   0x9   :  { %s439_s27 = scalar_lea.vmem %s29_s19, 2048  ;;  %p444_p4 = scmp.lt.s32.totalorder %s29_s19, %s29_s19 }
   0xa   :  { %p440_p3 = scmp.ne.s32.totalorder %s29_s19, %s439_s27  ;;  %p445_p5 = scmp.lt.s32.totalorder %s439_s27, %s439_s27 }
   0xc   :  { %p446_p6 = por %p445_p5, %p444_p4 }
   0xe   :  { %p447_p7 = pnand %p446_p6, %p440_p3 }
  0x10   :  { %450 = shalt.err (!%p447_p7)
}
  0x11   :  { %s524_s28 = smov 128   ;;  %s525_s29 = smov 8  }
  0x12   :  { %34 = dma.hbm_to_vmem [thread:$0]  %s639_s1, 2048, %s29_s19, [#allocation6], %s524_s28, %s524_s28, %s525_s29  }
  0x13   :  { %s526_s7 = smov [#allocation2]   ;;  %s527_s9 = smov [#allocation7]  }
  0x14   :  { %s19_s8 = sshll.u32 %s526_s7, 4  ;;  %s42_s10 = sshll.u32 %s527_s9, 4  ;;  %s20_s8 = int_to_ptr.vmem [resolvable:$true] %s19_s8  ;;  %s43_s10 = int_to_ptr.vmem [resolvable:$true] %s42_s10 }
  0x15   :  { %s451_s13 = scalar_lea.hbm %s638_s0, 128 }
  0x16   :  { %p452_p8 = scmp.ne.s32.totalorder %s638_s0, %s451_s13  ;;  %p455_p9 = scmp.lt.u32.totalorder %s451_s13, %s638_s0 }
  0x18   :  { %p457_p10 = pnand %p455_p9, %p452_p8 }
  0x1a   :  { %460 = shalt.err (!%p457_p10)
}
  0x1b   :  { %s461_s1 = scalar_lea.vmem %s20_s8, 128  ;;  %p466_p12 = scmp.lt.s32.totalorder %s20_s8, %s20_s8 }
  0x1c   :  { %p462_p11 = scmp.ne.s32.totalorder %s20_s8, %s461_s1  ;;  %p467_p13 = scmp.lt.s32.totalorder %s461_s1, %s461_s1 }
  0x1e   :  { %p468_p0 = por %p467_p13, %p466_p12 }
  0x20   :  { %p469_p1 = pnand %p468_p0, %p462_p11 }
  0x22   :  { %472 = shalt.err (!%p469_p1)
}
  0x23   :  { %22 = dma.hbm_to_vmem [thread:$0]  %s638_s0, 128, %s20_s8, [#allocation3]  }
  0x24   :  { %s473_s22 = scalar_lea.hbm %s641_s3, 2048 }
  0x25   :  { %p474_p2 = scmp.ne.s32.totalorder %s641_s3, %s473_s22  ;;  %p477_p3 = scmp.lt.u32.totalorder %s473_s22, %s641_s3 }
  0x27   :  { %p479_p4 = pnand %p477_p3, %p474_p2 }
  0x29   :  { %482 = shalt.err (!%p479_p4)
}
  0x2a   :  { %s483_s27 = scalar_lea.vmem %s43_s10, 2048  ;;  %p488_p6 = scmp.lt.s32.totalorder %s43_s10, %s43_s10 }
  0x2b   :  { %p484_p5 = scmp.ne.s32.totalorder %s43_s10, %s483_s27  ;;  %p489_p7 = scmp.lt.s32.totalorder %s483_s27, %s483_s27 }
  0x2d   :  { %p490_p8 = por %p489_p7, %p488_p6 }
  0x2f   :  { %p491_p9 = pnand %p490_p8, %p484_p5 }
  0x31   :  { %494 = shalt.err (!%p491_p9)
}
  0x32   :  { %48 = dma.hbm_to_vmem [thread:$0]  %s641_s3, 2048, %s43_s10, [#allocation6], %s524_s28, %s524_s28, %s525_s29  }
  0x33   :  { %517 = dma.done.wait [#allocation3], 128  }
  0x34   :  { %518 = vsyncadd [#allocation3], 4294967168 }
  0x35   :  { %519 = dma.done.wait [#allocation6], 4096  }
  0x36   :  { %520 = vsyncadd [#allocation6], 4294963200  ;;  %v528_v0 = vmov 0.0|0.0   ;;  %vm529_vm0 = vmmov 0   ;;  %v530_v1 = vmov 0.0   ;;  %v61_v2 = vld [vmem:[#allocation5] sm:$0xff] }
  0x37   :  { %372 = vmatprep.subr.bf16.mxu0 %v528_v0  ;;  %334 = vmatprep.mubr.msk.f32.mxu0 %vm529_vm0, %v530_v1  ;;  %v62_v3 = vld [vmem:[#allocation5 + $0x8] sm:$0xff]  ;;  %v63_v4 = vld [vmem:[#allocation5 + $0x10] sm:$0xff]  ;;  %v64_v6 = vld [vmem:[#allocation5 + $0x18] sm:$0xff]  ;;  %s531_s7 = smov [#allocation8]  }
  0x38   :  { %396 = vmatprep.subr.bf16.mxu1 %v528_v0  ;;  %369 = vmatprep.mubr.msk.f32.mxu1 %vm529_vm0, %v530_v1  ;;  %v373_v5 = vpack.c.bf16 %v62_v3, %v61_v2  ;;  %v376_v7 = vpack.c.bf16 %v64_v6, %v63_v4  ;;  %v65_v8 = vld [vmem:[#allocation5 + $0x20] sm:$0xff]  ;;  %v66_v9 = vld [vmem:[#allocation5 + $0x28] sm:$0xff]  ;;  %v157_v12 = vld [vmem:[#allocation7 + $0x10] sm:$0xff]  ;;  %s256_s8 = sshll.u32 %s531_s7, 4  ;;  %s257_s8 = int_to_ptr.vmem [resolvable:$true] %s256_s8 }
  0x39   :  { %v155_v10 = vld [vmem:[#allocation7] sm:$0xff]  ;;  %v156_v11 = vld [vmem:[#allocation7 + $0x8] sm:$0xff]  ;;  %v158_v13 = vld [vmem:[#allocation7 + $0x18] sm:$0xff]  ;;  %v379_v14 = vpack.c.bf16 %v66_v9, %v65_v8  ;;  %s495_s9 = scalar_lea.vmem %s257_s8, 128  ;;  %p500_p11 = scmp.lt.s32.totalorder %s257_s8, %s257_s8 }
  0x3a   :  { %374 = vmatpush3.bf16.msra.mxu0 %v373_v5  ;;  %v397_v15 = vpack.c.bf16 %v156_v11, %v155_v10  ;;  %v67_v16 = vld [vmem:[#allocation5 + $0x30] sm:$0xff]  ;;  %v68_v17 = vld [vmem:[#allocation5 + $0x38] sm:$0xff]  ;;  %v400_v18 = vpack.c.bf16 %v158_v13, %v157_v12  ;;  %v159_v19 = vld [vmem:[#allocation7 + $0x20] sm:$0xff]  ;;  %p496_p10 = scmp.ne.s32.totalorder %s257_s8, %s495_s9  ;;  %p501_p12 = scmp.lt.s32.totalorder %s495_s9, %s495_s9 }
  0x3b   :  { %375 = vmatprep.subr.bf16.mxu0 %v528_v0  ;;  %v160_v20 = vld [vmem:[#allocation7 + $0x28] sm:$0xff]  ;;  %v382_v21 = vpack.c.bf16 %v68_v17, %v67_v16  ;;  %v69_v22 = vld [vmem:[#allocation5 + $0x40] sm:$0xff]  ;;  %v161_v25 = vld [vmem:[#allocation7 + $0x30] sm:$0xff] }
  0x3c   :  { %398 = vmatpush3.bf16.msra.mxu1 %v397_v15  ;;  %v70_v23 = vld [vmem:[#allocation5 + $0x48] sm:$0xff]  ;;  %v403_v24 = vpack.c.bf16 %v160_v20, %v159_v19  ;;  %v162_v26 = vld [vmem:[#allocation7 + $0x38] sm:$0xff]  ;;  %v71_v28 = vld [vmem:[#allocation5 + $0x50] sm:$0xff]  ;;  %p502_p13 = por %p501_p12, %p500_p11 }
  0x3d   :  { %399 = vmatprep.subr.bf16.mxu1 %v528_v0  ;;  %v385_v27 = vpack.c.bf16 %v70_v23, %v69_v22  ;;  %v72_v29 = vld [vmem:[#allocation5 + $0x58] sm:$0xff]  ;;  %v406_v30 = vpack.c.bf16 %v162_v26, %v161_v25  ;;  %v163_v31 = vld [vmem:[#allocation7 + $0x40] sm:$0xff]  ;;  %v164_v32 = vld [vmem:[#allocation7 + $0x48] sm:$0xff] }
  0x3e   :  { %377 = vmatpush3.bf16.msra.mxu0 %v376_v7  ;;  %v388_v33 = vpack.c.bf16 %v72_v29, %v71_v28  ;;  %v73_v34 = vld [vmem:[#allocation5 + $0x60] sm:$0xff]  ;;  %v74_v35 = vld [vmem:[#allocation5 + $0x68] sm:$0xff]  ;;  %v409_v36 = vpack.c.bf16 %v164_v32, %v163_v31  ;;  %v165_v37 = vld [vmem:[#allocation7 + $0x50] sm:$0xff]  ;;  %p503_p0 = pnand %p502_p13, %p496_p10 }
  0x3f   :  { %378 = vmatprep.subr.bf16.mxu0 %v528_v0  ;;  %v166_v38 = vld [vmem:[#allocation7 + $0x58] sm:$0xff]  ;;  %v391_v39 = vpack.c.bf16 %v74_v35, %v73_v34  ;;  %v75_v40 = vld [vmem:[#allocation5 + $0x70] sm:$0xff]  ;;  %v167_v43 = vld [vmem:[#allocation7 + $0x60] sm:$0xff] }
  0x40   :  { %401 = vmatpush3.bf16.msra.mxu1 %v400_v18  ;;  %v76_v41 = vld [vmem:[#allocation5 + $0x78] sm:$0xff]  ;;  %v412_v42 = vpack.c.bf16 %v166_v38, %v165_v37  ;;  %v168_v44 = vld [vmem:[#allocation7 + $0x68] sm:$0xff]  ;;  %v169_v48 = vld [vmem:[#allocation7 + $0x70] sm:$0xff] }
  0x41   :  { %402 = vmatprep.subr.bf16.mxu1 %v528_v0  ;;  %v394_v45 = vpack.c.bf16 %v76_v41, %v75_v40  ;;  %v415_v46 = vpack.c.bf16 %v168_v44, %v167_v43  ;;  %v60_v47 = vld [vmem:[#allocation2] sm:$0xff] }
  0x42   :  { %380 = vmatpush3.bf16.msra.mxu0 %v379_v14  ;;  %v170_v49 = vld [vmem:[#allocation7 + $0x78] sm:$0xff] }
  0x43   :  { %381 = vmatprep.subr.bf16.mxu0 %v528_v0  ;;  %v418_v50 = vpack.c.bf16 %v170_v49, %v169_v48  ;;  %v266_v51 = vld [vmem:[%s640_s2] ss:$0 sm:$0xff] }
  0x44   :  { %404 = vmatpush3.bf16.msra.mxu1 %v403_v24  ;;  %v267_v56 = vld [vmem:[%s642_s4] ss:$0 sm:$0xff] }
  0x45   :  { %405 = vmatprep.subr.bf16.mxu1 %v528_v0 }
  0x46   :  { %383 = vmatpush3.bf16.msra.mxu0 %v382_v21 }
  0x47   :  { %384 = vmatprep.subr.bf16.mxu0 %v528_v0 }
  0x48   :  { %407 = vmatpush3.bf16.msra.mxu1 %v406_v30 }
  0x49   :  { %408 = vmatprep.subr.bf16.mxu1 %v528_v0 }
  0x4a   :  { %386 = vmatpush3.bf16.msra.mxu0 %v385_v27 }
  0x4b   :  { %387 = vmatprep.subr.bf16.mxu0 %v528_v0 }
  0x4c   :  { %410 = vmatpush3.bf16.msra.mxu1 %v409_v36 }
  0x4d   :  { %411 = vmatprep.subr.bf16.mxu1 %v528_v0 }
  0x4e   :  { %389 = vmatpush3.bf16.msra.mxu0 %v388_v33 }
  0x4f   :  { %390 = vmatprep.subr.bf16.mxu0 %v528_v0 }
  0x50   :  { %413 = vmatpush3.bf16.msra.mxu1 %v412_v42 }
  0x51   :  { %414 = vmatprep.subr.bf16.mxu1 %v528_v0 }
  0x52   :  { %392 = vmatpush3.bf16.msra.mxu0 %v391_v39 }
  0x53   :  { %393 = vmatprep.subr.bf16.mxu0 %v528_v0 }
  0x54   :  { %416 = vmatpush3.bf16.msra.mxu1 %v415_v46 }
  0x55   :  { %417 = vmatprep.subr.bf16.mxu1 %v528_v0 }
  0x56   :  { %395 = vmatpush3.bf16.msra.mxu0 %v394_v45 }
  0x58   :  { %419 = vmatpush3.bf16.msra.mxu1 %v418_v50 }
  0x59   :  { %335 = vmatmul.mubr.f32.vlgmr.msra.gmra.mrb[0].mxu0 %v60_v47 }
 0x12c   :  { %v150_v52 = vpop.f32.mrb[0].mxu0 }
 0x12d   :  { %v151_v53 = vadd.f32 %v266_v51, %v150_v52  ;;  %v336_v54 = vpop.f32.mrb[1].mxu0 }
 0x12f   :  { %v154_v55 = vmax.f32 %v151_v53, 0.0 }
 0x131   :  { %370 = vmatmul.mubr.f32.vlgmr.msra.gmra.mrb[0].mxu1 %v154_v55 }
 0x204   :  { %v244_v57 = vpop.f32.mrb[0].mxu1 }
 0x205   :  { %v245_v58 = vadd.f32 %v267_v56, %v244_v57  ;;  %v371_v59 = vpop.f32.mrb[1].mxu1 }
 0x207   :  { %v248_v60 = vmax.f32 %v245_v58, 0.0 }
 0x209   :  { %249 = vst [vmem:[#allocation8] sm:$0xff] %v248_v60 }
 0x20a   :  { %506 = shalt.err (!%p503_p0)
}
 0x20b   :  { %s507_s11 = scalar_lea.hbm %s643_s5, 128 }
 0x20c   :  { %p508_p1 = scmp.ne.s32.totalorder %s643_s5, %s507_s11  ;;  %p511_p2 = scmp.lt.u32.totalorder %s507_s11, %s643_s5 }
 0x20e   :  { %p513_p3 = pnand %p511_p2, %p508_p1 }
 0x210   :  { %516 = shalt.err (!%p513_p3)
}
 0x211   :  { %259 = dma.vmem_to_hbm [thread:$0]  %s257_s8, 128, %s643_s5, [#allocation4]  }
 0x212   :  { %521 = dma.done.wait [#allocation4], 128  }
 0x213   :  { %522 = vsyncadd [#allocation4], 4294967168 }
 0x214   :  { %263 = vsyncpa [#allocation3], 1 }
 0x215   :  { %264 = vsyncpa [#allocation6], 1 }
 0x216   :  { %265 = vsyncpa [#allocation4], 1 }

</bundles_post_ra>
